<compile_context>
chip_gen: v7x
topology: tpu7x:2x2x1
jax: 0.10.0
libtpu: 0.0.40
codegen_flags: <defaults>
</compile_context>

<pallas_src>
import math
from functools import partial

import numpy as np
import jax
import jax.numpy as jnp
from jax.experimental import pallas as pl
from jax.experimental.pallas import tpu as pltpu

# ----- small shapes consistent with the module's forward -----
B, H, W = 2, 16, 16
D_MODEL = 32            # args.d_model == backbone output channel count
KH = KW = 3             # stand-in conv1 stem
STRIDE = 2
PAD = 1

HO = (H + 2 * PAD - KH) // STRIDE + 1      # 8
WO = (W + 2 * PAD - KW) // STRIDE + 1      # 8
LANE = 128
KDIM = KH * KW                             # 9
KPAD = 16                                  # contraction dim padded to sublane multiple

# ----- packed weight buffer row layout (all offsets are multiples of 8) -----
ROW_WC = 0                                 # rows [0, 16)  lanes [0, 32): conv weights (9 valid rows)
ROW_W12 = ROW_WC + KPAD                    # rows [16, 48) lanes [0, 1) : folded classifier weight
ROW_WI = ROW_W12 + D_MODEL                 # rows [48, 56) lanes [0, n_pad): interpolation matrix
ROW_B12 = ROW_WI + HO                      # row 56        all lanes    : folded bias (broadcast)
WPACK_ROWS = ((ROW_B12 + 1 + 7) // 8) * 8  # 64


# --------- F.interpolate(..., mode='bilinear', align_corners=False) on a
# --------- (1,1,1,L) tensor == 1-D linear interp; build it as a [L, N] matrix.
def make_interp_matrix_np(l_in, n_out):
    m = np.zeros((l_in, n_out), np.float32)
    scale = l_in / n_out
    for i in range(n_out):
        src = max((i + 0.5) * scale - 0.5, 0.0)
        i0 = min(int(math.floor(src)), l_in - 1)
        i1 = min(i0 + 1, l_in - 1)
        w1 = src - i0
        m[i0, i] += 1.0 - w1
        m[i1, i] += w1
    return m


# --------- im2col glue (plain JAX; fused by XLA under jit) ---------
def im2col_wo_major(x):
    # x: [B, 1, H, W] (NCHW, single input channel as in the modified conv1)
    # Rows ordered (wo, b, ho) so the in-kernel max over W is a leading-axis
    # reduction -> pure VPU maximum tree, no relayout.
    b = x.shape[0]
    xp = jnp.pad(x[:, 0], ((0, 0), (PAD, PAD), (PAD, PAD)))
    taps = []
    for kh in range(KH):
        for kw in range(KW):
            taps.append(xp[:, kh:kh + STRIDE * HO:STRIDE, kw:kw + STRIDE * WO:STRIDE])
    p = jnp.stack(taps, axis=-1)               # [B, HO, WO, KH*KW]
    p = jnp.transpose(p, (2, 0, 1, 3))         # [WO, B, HO, KH*KW]
    p = p.reshape(WO * b * HO, KDIM)
    # pad contraction dim to KPAD so the packed conv-weight slice is 8-row aligned
    return jnp.pad(p, ((0, 0), (0, KPAD - KDIM)))


# --------- pack all static operands into one lane-aligned VMEM buffer ---------
def pack_weights(wc, w1, b1, w2, b2, n, n_pad):
    # fold the two classifier linears (no nonlinearity between them)
    w12 = w1 @ w2                              # [D, 1]
    b12 = (b1 @ w2 + b2)[0, 0]                 # scalar
    # interpolation matrix, zero-padded on the lane axis (compile-time const)
    wi_np = np.zeros((HO, n_pad), np.float32)
    wi_np[:, :n] = make_interp_matrix_np(HO, n)
    pack = jnp.zeros((WPACK_ROWS, n_pad), jnp.float32)
    pack = pack.at[ROW_WC:ROW_WC + KDIM, 0:D_MODEL].set(wc)
    pack = pack.at[ROW_W12:ROW_W12 + D_MODEL, 0:1].set(w12)
    pack = pack.at[ROW_WI:ROW_WI + HO, :].set(jnp.asarray(wi_np))
    pack = pack.at[ROW_B12, :].set(b12)
    return pack


# --------- fused Pallas kernel ---------
def make_kernel(b, ho, wo):
    rows = b * ho

    def kernel(patches_ref, wpack_ref, out_ref):
        # conv stem as matmul + ReLU; rows ordered (wo, b, ho):  [WO*B*HO, D]
        wc = wpack_ref[ROW_WC:ROW_WC + KPAD, 0:D_MODEL]          # [16, 32]
        conv = jnp.dot(patches_ref[...], wc,
                       preferred_element_type=jnp.float32)
        conv = jnp.maximum(conv, 0.0)
        # torch.max(cnn_feat, dim=-1).values (max over W) as a leading-axis
        # reduction: tree of whole-vreg jnp.maximum over [B*HO, D] slabs (VPU).
        feat = conv[0:rows]
        for k in range(1, wo):
            feat = jnp.maximum(feat, conv[k * rows:(k + 1) * rows])   # [B*HO, D]
        # classifier: Dropout(eval=id) -> Linear(d,d) -> Linear(d,1), folded
        # host-side into a single Linear(d,1) weight; bias handled after interp.
        w12 = wpack_ref[ROW_W12:ROW_W12 + D_MODEL, 0:1]          # [32, 1]
        y = jnp.dot(feat, w12, preferred_element_type=jnp.float32)    # [B*HO, 1]
        # per-sample bilinear interpolation of the length-HO profile as a single
        # MXU matmul onto a lane-padded [HO, N_pad] matrix; bilinear columns sum
        # to 1 so adding the folded bias after the matmul is exact.
        wi = wpack_ref[ROW_WI:ROW_WI + HO, :]                    # [HO, N_pad]
        b12 = wpack_ref[ROW_B12:ROW_B12 + 1, :]                  # [1, N_pad]
        out_ref[...] = jnp.dot(y.reshape(b, ho), wi,
                               preferred_element_type=jnp.float32) + b12
    return kernel


# --------- jitted forward (constants folded at trace time; one dispatch) ---------
@partial(jax.jit, static_argnames=("n",))
def _l3loc_forward_jit(x, wc, w1, b1, w2, b2, *, n):
    b = x.shape[0]
    n_pad = max(LANE, ((n + LANE - 1) // LANE) * LANE)   # lane-dense output
    wpack = pack_weights(wc, w1, b1, w2, b2, n, n_pad)   # single static-operand DMA
    patches = im2col_wo_major(x)                         # [WO*B*HO, KPAD]

    rows = WO * b * HO
    flops = (2 * rows * KPAD * D_MODEL        # conv stem matmul
             + 2 * (b * HO) * D_MODEL         # folded classifier
             + 2 * b * HO * n_pad)            # interpolation matmul
    bytes_accessed = 4 * (patches.size + wpack.size + b * n_pad)

    out_pad = pl.pallas_call(
        make_kernel(b, HO, WO),
        out_shape=jax.ShapeDtypeStruct((b, n_pad), jnp.float32),
        in_specs=[
            pl.BlockSpec(memory_space=pltpu.MemorySpace.VMEM),   # patches
            pl.BlockSpec(memory_space=pltpu.MemorySpace.VMEM),   # packed weights
        ],
        out_specs=pl.BlockSpec(memory_space=pltpu.MemorySpace.VMEM),
        cost_estimate=pl.CostEstimate(flops=flops, transcendentals=0,
                                      bytes_accessed=bytes_accessed),
    )(patches, wpack)
    return out_pad[:, :n]


def l3loc_forward(x, n_lst, params):
    # torch.stack in the reference forward requires all N in N_lst to be equal
    assert len(n_lst) == x.shape[0] and len(set(int(v) for v in n_lst)) == 1, \
        "torch.stack in the reference forward requires all N in N_lst to be equal"
    wc, w1, b1, w2, b2 = params
    return _l3loc_forward_jit(x, wc, w1, b1, w2, b2, n=int(n_lst[0]))


# --------- pure-JAX reference (unfolded params, for correctness check) ---------
def l3loc_reference(x, n_lst, params):
    wc, w1, b1, w2, b2 = params
    n = int(n_lst[0])
    wi = jnp.asarray(make_interp_matrix_np(HO, n))
    xp = jnp.pad(x[:, 0], ((0, 0), (PAD, PAD), (PAD, PAD)))
    cols = []
    for kh in range(KH):
        for kw in range(KW):
            cols.append(xp[:, kh:kh + STRIDE * HO:STRIDE, kw:kw + STRIDE * WO:STRIDE])
    patches = jnp.stack(cols, axis=-1)                       # [B, HO, WO, 9]
    conv = jnp.maximum(patches @ wc, 0.0)                    # [B, HO, WO, D]
    feat = conv.max(axis=2)                                  # max over W -> [B, HO, D]
    y = (feat @ w1 + b1[0]) @ w2 + b2[0, 0]                  # [B, HO, 1]
    return y[..., 0] @ wi                                    # [B, N]


def init_params(key):
    kc, k1, kb1, k2, kb2 = jax.random.split(key, 5)
    wc = jax.random.normal(kc, (KH * KW, D_MODEL), jnp.float32) / math.sqrt(KH * KW)
    w1 = jax.random.normal(k1, (D_MODEL, D_MODEL), jnp.float32) / math.sqrt(D_MODEL)
    b1 = jax.random.normal(kb1, (1, D_MODEL), jnp.float32) * 0.01
    w2 = jax.random.normal(k2, (D_MODEL, 1), jnp.float32) / math.sqrt(D_MODEL)
    b2 = jax.random.normal(kb2, (1, 1), jnp.float32) * 0.01
    return wc, w1, b1, w2, b2


if __name__ == "__main__":
    key = jax.random.PRNGKey(0)
    kp, kx = jax.random.split(key)
    params = init_params(kp)
    x = jax.random.normal(kx, (B, 1, H, W), jnp.float32)   # NCHW, 1 input channel
    n_lst = [12, 12]

    pred = jax.block_until_ready(l3loc_forward(x, n_lst, params))
    assert pred.shape == (B, n_lst[0])

    ref = l3loc_reference(x, n_lst, params)
    np.testing.assert_allclose(np.asarray(pred), np.asarray(ref), rtol=1e-4, atol=1e-4)
    print("KERNEL_OK")
</pallas_src>

<mosaic_0001>
module attributes {stable_mosaic.version = 11 : i64} {
  func.func @kernel(%arg0: memref<128x16xf32, #tpu.memory_space<vmem>>, %arg1: memref<64x128xf32, #tpu.memory_space<vmem>>, %arg2: memref<2x128xf32, #tpu.memory_space<vmem>>) attributes {dimension_semantics = [], scalar_prefetch = 0 : i64, scratch_operands = 0 : i64, tpu.core_type = #tpu.core_type<tc>} {
    %c0 = arith.constant 0 : index
    %c0_0 = arith.constant 0 : index
    %0 = vector.load %arg1[%c0, %c0_0] : memref<64x128xf32, #tpu.memory_space<vmem>>, vector<16x32xf32>
    %c0_1 = arith.constant 0 : index
    %c0_2 = arith.constant 0 : index
    %1 = vector.load %arg0[%c0_1, %c0_2] : memref<128x16xf32, #tpu.memory_space<vmem>>, vector<128x16xf32>
    %cst = arith.constant dense<0.000000e+00> : vector<128x32xf32>
    %2 = tpu.matmul %1, %0, %cst {dimension_numbers = #tpu.dot_dimension_numbers<[1], [0], [0], [1], [0, 0, 1, 1], [], []>} : vector<128x16xf32>, vector<16x32xf32>, vector<128x32xf32> -> vector<128x32xf32>
    %cst_3 = arith.constant 0.000000e+00 : f32
    %3 = vector.broadcast %cst_3 : f32 to vector<128x32xf32>
    %4 = arith.maximumf %2, %3 : vector<128x32xf32>
    %5 = vector.extract_strided_slice %4 {offsets = [0, 0], sizes = [16, 32], strides = [1, 1]} : vector<128x32xf32> to vector<16x32xf32>
    %6 = vector.extract_strided_slice %4 {offsets = [16, 0], sizes = [16, 32], strides = [1, 1]} : vector<128x32xf32> to vector<16x32xf32>
    %7 = arith.maximumf %5, %6 : vector<16x32xf32>
    %8 = vector.extract_strided_slice %4 {offsets = [32, 0], sizes = [16, 32], strides = [1, 1]} : vector<128x32xf32> to vector<16x32xf32>
    %9 = arith.maximumf %7, %8 : vector<16x32xf32>
    %10 = vector.extract_strided_slice %4 {offsets = [48, 0], sizes = [16, 32], strides = [1, 1]} : vector<128x32xf32> to vector<16x32xf32>
    %11 = arith.maximumf %9, %10 : vector<16x32xf32>
    %12 = vector.extract_strided_slice %4 {offsets = [64, 0], sizes = [16, 32], strides = [1, 1]} : vector<128x32xf32> to vector<16x32xf32>
    %13 = arith.maximumf %11, %12 : vector<16x32xf32>
    %14 = vector.extract_strided_slice %4 {offsets = [80, 0], sizes = [16, 32], strides = [1, 1]} : vector<128x32xf32> to vector<16x32xf32>
    %15 = arith.maximumf %13, %14 : vector<16x32xf32>
    %16 = vector.extract_strided_slice %4 {offsets = [96, 0], sizes = [16, 32], strides = [1, 1]} : vector<128x32xf32> to vector<16x32xf32>
    %17 = arith.maximumf %15, %16 : vector<16x32xf32>
    %18 = vector.extract_strided_slice %4 {offsets = [112, 0], sizes = [16, 32], strides = [1, 1]} : vector<128x32xf32> to vector<16x32xf32>
    %19 = arith.maximumf %17, %18 : vector<16x32xf32>
    %c16 = arith.constant 16 : index
    %c0_4 = arith.constant 0 : index
    %20 = vector.load %arg1[%c16, %c0_4] : memref<64x128xf32, #tpu.memory_space<vmem>>, vector<32x1xf32>
    %cst_5 = arith.constant dense<0.000000e+00> : vector<16x1xf32>
    %21 = tpu.matmul %19, %20, %cst_5 {dimension_numbers = #tpu.dot_dimension_numbers<[1], [0], [0], [1], [0, 0, 1, 1], [], []>} : vector<16x32xf32>, vector<32x1xf32>, vector<16x1xf32> -> vector<16x1xf32>
    %c48 = arith.constant 48 : index
    %c0_6 = arith.constant 0 : index
    %22 = vector.load %arg1[%c48, %c0_6] : memref<64x128xf32, #tpu.memory_space<vmem>>, vector<8x128xf32>
    %c56 = arith.constant 56 : index
    %c0_7 = arith.constant 0 : index
    %23 = vector.load %arg1[%c56, %c0_7] : memref<64x128xf32, #tpu.memory_space<vmem>>, vector<1x128xf32>
    %24 = vector.shape_cast %21 : vector<16x1xf32> to vector<2x8xf32>
    %cst_8 = arith.constant dense<0.000000e+00> : vector<2x128xf32>
    %25 = tpu.matmul %24, %22, %cst_8 {dimension_numbers = #tpu.dot_dimension_numbers<[1], [0], [0], [1], [0, 0, 1, 1], [], []>} : vector<2x8xf32>, vector<8x128xf32>, vector<2x128xf32> -> vector<2x128xf32>
    %26 = vector.broadcast %23 : vector<1x128xf32> to vector<2x128xf32>
    %27 = arith.addf %25, %26 : vector<2x128xf32>
    %c0_9 = arith.constant 0 : index
    %c0_10 = arith.constant 0 : index
    %28 = vector.load %arg2[%c0_9, %c0_10] : memref<2x128xf32, #tpu.memory_space<vmem>>, vector<2x128xf32>
    tpu.vector_store %arg2[%c0_9, %c0_10], %27 {strides = array<i32>} : memref<2x128xf32, #tpu.memory_space<vmem>>, vector<2x128xf32>,
    return
  }
}

</mosaic_0001>

<bundles_post_ra>
// kernel: _l3loc_forward_jit.1
= control target key start
LH: loop header
LB: loop body
LE: loop exit
PB: predicated region body
PF: predicated region fallthrough
CT: control target
= control target key end

     0   :  { %vm30_vm0 = vcmask 130048   ;;  %s706_s0 = inlined_call_operand.vmem [shape: f32[128,16], index: 0, kind: input, shape index: {}]   ;;  %s707_s1 = inlined_call_operand.vmem [shape: f32[64,128], index: 1, kind: input, shape index: {}]   ;;  %s708_s2 = inlined_call_operand.hbm [shape: f32[2,128], index: 2, kind: output, shape index: {}]  }
   0x1   :  { %v12_v0 = vld [vmem:[%s707_s1] sm:$0xff]  ;;  %v13_v1 = vld [vmem:[%s707_s1 + $0x8] sm:$0xff]  ;;  %v24_v4 = vld [vmem:[%s706_s0 + $0x50] sm:$0xff] }
   0x2   :  { %v14_v2 = vld [vmem:[%s706_s0] sm:$0xff]  ;;  %v544_v3 = vpack.c.bf16 %v13_v1, %v12_v0  ;;  %v15_v5 = vld [vmem:[%s706_s0 + $0x8] sm:$0xff]  ;;  %v25_v6 = vld [vmem:[%s706_s0 + $0x58] sm:$0xff]  ;;  %519 = vmatprep.mubr.msk.f32.mxu1 %vm30_vm0, %v24_v4 }
   0x3   :  { %504 = vmatprep.mubr.msk.f32.mxu0 %vm30_vm0, %v14_v2  ;;  %v16_v7 = vld [vmem:[%s706_s0 + $0x10] sm:$0xff]  ;;  %v26_v8 = vld [vmem:[%s706_s0 + $0x60] sm:$0xff] }
   0x4   :  { %545 = vmatprep.subr.bf16.mxu0 %v544_v3  ;;  %556 = vmatprep.subr.bf16.mxu1 %v544_v3 }
   0x5   :  { %547 = vmatpush3.bf16.msra.mxu0 %v544_v3  ;;  %557 = vmatpush3.bf16.msra.mxu1 %v544_v3 }
   0x6   :  { %7 = vsyncpa [#allocation3], 0  ;;  %v17_v9 = vld [vmem:[%s706_s0 + $0x18] sm:$0xff]  ;;  %v27_v10 = vld [vmem:[%s706_s0 + $0x68] sm:$0xff]  ;;  %vm258_vm1 = vcmask 261120   ;;  %vm589_vm2 = vmmov 0  }
   0x7   :  { %v18_v11 = vld [vmem:[%s706_s0 + $0x20] sm:$0xff]  ;;  %v28_v12 = vld [vmem:[%s706_s0 + $0x70] sm:$0xff]  ;;  %v19_v13 = vld [vmem:[%s706_s0 + $0x28] sm:$0xff]  ;;  %vm364_vm3 = vcmask 1041409   ;;  %vm366_vm4 = vcmask 64512   ;;  %s590_s28 = smov [#allocation2]  }
   0x8   :  { %505 = vmatmul.mubr.msk.f32.vlgmr.msra.gmra.mrb[0].mxu0 %vm30_vm0, %v15_v5  ;;  %520 = vmatmul.mubr.msk.f32.vlgmr.msra.gmra.mrb[0].mxu1 %vm30_vm0, %v25_v6  ;;  %v29_v14 = vld [vmem:[%s706_s0 + $0x78] sm:$0xff]  ;;  %v20_v15 = vld [vmem:[%s706_s0 + $0x30] sm:$0xff]  ;;  %v22_v17 = vld [vmem:[%s706_s0 + $0x40] sm:$0xff]  ;;  %s446_s29 = sshll.u32 %s590_s28, 4  ;;  %s447_s29 = int_to_ptr.vmem [resolvable:$true] %s446_s29 }
   0x9   :  { %507 = vmatprep.mubr.msk.f32.mxu0 %vm30_vm0, %v16_v7  ;;  %522 = vmatprep.mubr.msk.f32.mxu1 %vm30_vm0, %v26_v8  ;;  %v21_v16 = vld [vmem:[%s706_s0 + $0x38] sm:$0xff]  ;;  %v23_v18 = vld [vmem:[%s706_s0 + $0x48] sm:$0xff]  ;;  %v254_v19 = vld [vmem:[%s707_s1 + $0x10] sm:$0xff]  ;;  %v587_v7 = vmov 0   ;;  %s563_s30 = scalar_lea.vmem %s447_s29, 32  ;;  %p568_p1 = scmp.lt.s32.totalorder %s447_s29, %s447_s29 }
   0xa   :  { %v255_v20 = vld [vmem:[%s707_s1 + $0x18] sm:$0xff]  ;;  %v256_v22 = vld [vmem:[%s707_s1 + $0x20] sm:$0xff]  ;;  %v257_v23 = vld [vmem:[%s707_s1 + $0x28] sm:$0xff]  ;;  %562 = vset.pattern.permute.xlu0 %v587_v7  ;;  %p564_p0 = scmp.ne.s32.totalorder %s447_s29, %s563_s30  ;;  %p569_p2 = scmp.lt.s32.totalorder %s563_s30, %s563_s30 }
   0xb   :  { %v548_v21 = vpack.c.bf16 %v255_v20, %v254_v19  ;;  %v552_v24 = vpack.c.bf16 %v257_v23, %v256_v22 }
   0xc   :  { %508 = vmatmul.mubr.msk.f32.gmra.mrb[2].mxu0 %vm30_vm0, %v17_v9  ;;  %523 = vmatmul.mubr.msk.f32.gmra.mrb[2].mxu1 %vm30_vm0, %v27_v10  ;;  %v340_v10 = vld [vmem:[%s707_s1 + $0x30] sm:$0xff]  ;;  %p570_p3 = por %p569_p2, %p568_p1 }
   0xd   :  { %510 = vmatprep.mubr.msk.f32.mxu0 %vm30_vm0, %v18_v11  ;;  %525 = vmatprep.mubr.msk.f32.mxu1 %vm30_vm0, %v28_v12  ;;  %v588_v11 = vmov 0.0   ;;  %v354_v12 = vlaneseq }
   0xe   :  { %549 = vmatprep.subr.bf16.mxu1 %v548_v21  ;;  %p571_p4 = pnand %p570_p3, %p564_p0 }
   0xf   :  { %551 = vmatpush3.bf16.msra.mxu1 %v548_v21  ;;  %v472_v21 = vld [vmem:[%s707_s1 + $0x38] ss:$0 sm:$0xff] }
  0x10   :  { %511 = vmatmul.mubr.msk.f32.gmra.mrb[4].mxu0 %vm30_vm0, %v19_v13  ;;  %526 = vmatmul.mubr.msk.f32.gmra.mrb[4].mxu1 %vm30_vm0, %v29_v14  ;;  %v355_v13 = vand.u32 127, %v354_v12  ;;  %v357_v14 = vshrl.u32 %v354_v12, 7 }
  0x11   :  { %513 = vmatprep.mubr.msk.f32.mxu0 %vm30_vm0, %v20_v15  ;;  %553 = vmatprep.subr.bf16.mxu1 %v552_v24 }
  0x13   :  { %555 = vmatpush3.bf16.msra.mxu1 %v552_v24 }
  0x14   :  { %514 = vmatmul.mubr.msk.f32.gmra.mrb[6].mxu0 %vm30_vm0, %v21_v16  ;;  %539 = vmatprep.subr.mxu1 %v588_v11  ;;  %v358_v16 = vsub.s32 %v355_v13, %v357_v14 }
  0x15   :  { %516 = vmatprep.mubr.msk.f32.mxu0 %vm30_vm0, %v22_v17 }
  0x18   :  { %517 = vmatmul.mubr.msk.f32.gmra.mrb[8].mxu0 %vm30_vm0, %v23_v18 }
  0xdb   :  { %v506_v25 = vpop.f32.mrb[0].mxu0  ;;  %v521_v26 = vpop.f32.mrb[0].mxu1 }
  0xdc   :  { %v145_v27 = vpop.f32.mrb[1].mxu0  ;;  %v195_v28 = vpop.f32.mrb[1].mxu1  ;;  %v225_v31 = vmax.f32 %v506_v25, 0.0  ;;  %v235_v57 = vmax.f32 %v521_v26, 0.0 }
  0xdd   :  { %v224_v35 = vmax.f32 %v145_v27, 0.0  ;;  %v234_v59 = vmax.f32 %v195_v28, 0.0 }
  0xdf   :  { %v509_v29 = vpop.f32.mrb[2].mxu0  ;;  %v524_v30 = vpop.f32.mrb[2].mxu1 }
  0xe0   :  { %v227_v32 = vmax.f32 %v509_v29, 0.0  ;;  %v155_v33 = vpop.f32.mrb[3].mxu0  ;;  %v205_v34 = vpop.f32.mrb[3].mxu1  ;;  %v237_v61 = vmax.f32 %v524_v30, 0.0 }
  0xe1   :  { %v226_v36 = vmax.f32 %v155_v33, 0.0  ;;  %v236_v1 = vmax.f32 %v205_v34, 0.0 }
  0xe2   :  { %v241_v37 = vmax.f32 %v225_v31, %v227_v32 }
  0xe3   :  { %v240_v38 = vmax.f32 %v224_v35, %v226_v36  ;;  %v512_v39 = vpop.f32.mrb[4].mxu0  ;;  %v527_v40 = vpop.f32.mrb[4].mxu1 }
  0xe4   :  { %v229_v41 = vmax.f32 %v512_v39, 0.0  ;;  %v165_v42 = vpop.f32.mrb[5].mxu0  ;;  %v215_v43 = vpop.f32.mrb[5].mxu1  ;;  %v239_v63 = vmax.f32 %v527_v40, 0.0 }
  0xe5   :  { %v228_v44 = vmax.f32 %v165_v42, 0.0  ;;  %v238_v2 = vmax.f32 %v215_v43, 0.0 }
  0xe6   :  { %v243_v45 = vmax.f32 %v241_v37, %v229_v41 }
  0xe7   :  { %v242_v46 = vmax.f32 %v240_v38, %v228_v44  ;;  %v515_v47 = vpop.f32.mrb[6].mxu0 }
  0xe8   :  { %v231_v48 = vmax.f32 %v515_v47, 0.0  ;;  %v175_v49 = vpop.f32.mrb[7].mxu0 }
  0xe9   :  { %v230_v50 = vmax.f32 %v175_v49, 0.0 }
  0xea   :  { %v245_v51 = vmax.f32 %v243_v45, %v231_v48 }
  0xeb   :  { %v244_v52 = vmax.f32 %v242_v46, %v230_v50  ;;  %v518_v53 = vpop.f32.mrb[8].mxu0 }
  0xec   :  { %v233_v54 = vmax.f32 %v518_v53, 0.0  ;;  %v185_v55 = vpop.f32.mrb[9].mxu0 }
  0xed   :  { %v232_v56 = vmax.f32 %v185_v55, 0.0 }
  0xee   :  { %v247_v58 = vmax.f32 %v245_v51, %v233_v54 }
  0xef   :  { %v246_v60 = vmax.f32 %v244_v52, %v232_v56 }
  0xf0   :  { %v249_v62 = vmax.f32 %v247_v58, %v235_v57 }
  0xf1   :  { %v248_v0 = vmax.f32 %v246_v60, %v234_v59 }
  0xf2   :  { %v251_v3 = vmax.f32 %v249_v62, %v237_v61 }
  0xf3   :  { %v250_v4 = vmax.f32 %v248_v0, %v236_v1 }
  0xf4   :  { %v253_v5 = vmax.f32 %v251_v3, %v239_v63 }
  0xf5   :  { %v252_v6 = vmax.f32 %v250_v4, %v238_v2 }
  0xf7   :  { %536 = vmatprep.mubr.msk.f32.mxu1 %vm258_vm1, %v252_v6 }
  0xf8   :  { %537 = vmatmul.mubr.msk.f32.vlgmr.msra.gmra.mrb[6].mxu1 %vm258_vm1, %v253_v5 }
  0xf9   :  { %540 = vmatpush3.msra.mxu1 %v340_v10  ;;  %541 = vmatprep.mubr.msk.f32.mxu1 %vm589_vm2, %v588_v11 }
 0x1cb   :  { %v538_v8 = vpop.f32.mrb[6].mxu1 }
 0x1cc   :  { %v331_v9 = vpop.f32.mrb[7].mxu1 }
 0x1cd   :  { %349 = vperm.xlu0 %562, %v331_v9  }
 0x1d1   :  { %352 = vperm.xlu0 %562, %v538_v8  }
 0x24c   :  { %v350_v15 = vpop.permute.xlu0 %349 }
 0x24d   :  { %v359_v18 = vrot.slane %v350_v15, %v358_v16 }
 0x250   :  { %v353_v17 = vpop.permute.xlu0 %352 }
 0x251   :  { %v363_v19 = vrot.slane %v353_v17, %v358_v16 }
 0x253   :  { %v365_v20 = vsel %vm364_vm3, %v363_v19, %v359_v18 }
 0x254   :  { %542 = vmatmul.mubr.msk.f32.vlgmr.msra.gmra.mrb[8].mxu1 %vm366_vm4, %v365_v20 }
 0x327   :  { %v435_v22 = vpop.f32.mrb[8].mxu1 }
 0x328   :  { %v436_v23 = vadd.f32 %v472_v21, %v435_v22  ;;  %v543_v24 = vpop.f32.mrb[9].mxu1 }
 0x32a   :  { %439 = vst [vmem:[#allocation2] sm:$0x3] %v436_v23 }
 0x32b   :  { %574 = shalt.err (!%p571_p4)
}
 0x32c   :  { %s575_s5 = scalar_lea.hbm %s708_s2, 32 }
 0x32d   :  { %p576_p5 = scmp.ne.s32.totalorder %s708_s2, %s575_s5  ;;  %p579_p6 = scmp.lt.u32.totalorder %s575_s5, %s708_s2 }
 0x32f   :  { %p581_p7 = pnand %p579_p6, %p576_p5 }
 0x331   :  { %584 = shalt.err (!%p581_p7)
}
 0x332   :  { %449 = dma.vmem_to_hbm [thread:$0]  %s447_s29, 32, %s708_s2, [#allocation3]  }
 0x333   :  { %585 = dma.done.wait [#allocation3], 32  }
 0x334   :  { %586 = vsyncadd [#allocation3], 4294967264 }
 0x335   :  { %453 = vsyncpa [#allocation3], 1 }

</bundles_post_ra>
